<compile_context>
chip_gen: v5e
topology: v5e:2x2
jax: 0.10.0
libtpu: 0.0.40
codegen_flags: <defaults>
</compile_context>

<pallas_src>
import functools

import jax
import jax.numpy as jnp
from jax.experimental import pallas as pl
from jax.experimental.pallas import tpu as pltpu


# ----------------------------------------------------------------------------
# Kernels
# ----------------------------------------------------------------------------

def _smear_rows_kernel(dist_ref, offset_ref, out_ref, *, coeff):
    # dist_ref: (TM, 1) f32   offset_ref: (1, G) f32   out_ref: (TM, G)
    d = dist_ref[...] - offset_ref[...]            # broadcast -> (TM, G)
    out_ref[...] = jnp.exp(coeff * d * d).astype(out_ref.dtype)


def _smear_lane_dense_kernel(dist_ref, offset_ref, out_ref, *, coeff):
    # dist_ref: (1, TN) f32   offset_ref: (G, 1) f32   out_ref: (G, TN)
    # N sits on the lane axis -> full 128-lane vregs for the exp and unmasked
    # stores; only the tiny (G, 1) offset column needs a lane splat.
    d = dist_ref[...] - offset_ref[...]            # broadcast -> (G, TN)
    out_ref[...] = jnp.exp(coeff * d * d).astype(out_ref.dtype)


# ----------------------------------------------------------------------------
# Wrappers
# ----------------------------------------------------------------------------

_VMEM_LIMIT = 32 * 1024 * 1024  # safe on v5e/v6e/v7x; far above what we use


def gaussian_smearing(dist, offset, coeff, *, block_m=1024,
                      out_dtype=jnp.float32):
    """Row-major result, matches the PyTorch forward: (N, G)."""
    g = offset.shape[0]
    d = dist.reshape(-1, 1).astype(jnp.float32)
    n = d.shape[0]

    # Sublane-aligned row block; don't over-tile tiny inputs.
    tm = min(int(block_m), max(8, ((n + 7) // 8) * 8))

    kernel = functools.partial(_smear_rows_kernel, coeff=float(coeff))
    off = offset.reshape(1, g).astype(jnp.float32)

    return pl.pallas_call(
        kernel,
        out_shape=jax.ShapeDtypeStruct((n, g), out_dtype),
        grid=(pl.cdiv(n, tm),),
        in_specs=[
            pl.BlockSpec((tm, 1), lambda i: (i, 0)),
            pl.BlockSpec((1, g), lambda i: (0, 0)),
        ],
        out_specs=pl.BlockSpec((tm, g), lambda i: (i, 0)),
        compiler_params=pltpu.CompilerParams(
            dimension_semantics=("parallel",),
            vmem_limit_bytes=_VMEM_LIMIT,
        ),
    )(d, off)


def gaussian_smearing_lane_dense(dist, offset, coeff, *, block_n=2048,
                                 out_dtype=jnp.float32):
    """Lane-dense variant: result is (G, N) (transposed). Use this when the
    consumer can take G-major data (e.g. it contracts over G right after)."""
    g = offset.shape[0]
    d = dist.reshape(1, -1).astype(jnp.float32)
    n = d.shape[1]

    # Lane-aligned column block (multiple of 128); don't over-tile tiny inputs.
    tn = min(int(block_n), max(128, ((n + 127) // 128) * 128))

    kernel = functools.partial(_smear_lane_dense_kernel, coeff=float(coeff))
    off = offset.reshape(g, 1).astype(jnp.float32)

    return pl.pallas_call(
        kernel,
        out_shape=jax.ShapeDtypeStruct((g, n), out_dtype),
        grid=(pl.cdiv(n, tn),),
        in_specs=[
            pl.BlockSpec((1, tn), lambda i: (0, i)),
            pl.BlockSpec((g, 1), lambda i: (0, 0)),
        ],
        out_specs=pl.BlockSpec((g, tn), lambda i: (0, i)),
        compiler_params=pltpu.CompilerParams(
            dimension_semantics=("parallel",),
            vmem_limit_bytes=_VMEM_LIMIT,
        ),
    )(d, off)


# ----------------------------------------------------------------------------
# Module wrapper (mirrors the PyTorch GaussianSmearing)
# ----------------------------------------------------------------------------

class GaussianSmearingJax:
    """Mirrors torch GaussianSmearing: offset = linspace(start, stop, G),
    coeff = -0.5 / (offset[1] - offset[0])**2, forward returns (N, G)."""

    def __init__(self, start=0.0, stop=5.0, num_gaussians=50):
        self.offset = jnp.linspace(start, stop, num_gaussians,
                                   dtype=jnp.float32)
        if num_gaussians > 1:
            step = float(self.offset[1] - self.offset[0])
        else:
            step = 1.0  # guard (the PyTorch original divides by zero here)
        self.coeff = -0.5 / step ** 2
        # NOTE: coeff is baked into the kernel as a Python constant; changing
        # start/stop/num_gaussians triggers a recompile (module-style usage).

    def __call__(self, dist, *, out_dtype=jnp.float32):
        return gaussian_smearing(dist, self.offset, self.coeff,
                                 out_dtype=out_dtype)


# ----------------------------------------------------------------------------
# Demo / correctness check
# ----------------------------------------------------------------------------

if __name__ == "__main__":
    key = jax.random.PRNGKey(0)
    n_edges = 100  # small example: SchNet-style edge distances in [0, 5)
    dist = jax.random.uniform(key, (n_edges,), dtype=jnp.float32,
                              minval=0.0, maxval=5.0)

    module = GaussianSmearingJax(start=0.0, stop=5.0, num_gaussians=50)

    # Primary (module-contract) path: (N, G), float32.
    out = module(dist)
    out = jax.block_until_ready(out)

    # Plain-JAX reference (same math as the PyTorch forward).
    ref = jnp.exp(
        module.coeff
        * (dist.reshape(-1, 1) - module.offset.reshape(1, -1)) ** 2
    )
    assert out.shape == (n_edges, 50), out.shape
    assert jnp.allclose(out, ref, atol=1e-6, rtol=1e-6), float(
        jnp.max(jnp.abs(out - ref)))

    # Lane-dense (G, N) variant for consumers that accept the transposed layout.
    out_t = gaussian_smearing_lane_dense(dist, module.offset, module.coeff)
    out_t = jax.block_until_ready(out_t)
    assert out_t.shape == (50, n_edges), out_t.shape
    assert jnp.allclose(out_t.T, ref, atol=1e-6, rtol=1e-6), float(
        jnp.max(jnp.abs(out_t.T - ref)))

    print("KERNEL_OK")
</pallas_src>

<mosaic_0001>
module attributes {stable_mosaic.version = 11 : i64} {
  func.func @_smear_rows_kernel(%arg0: i32, %arg1: memref<104x1xf32, #tpu.memory_space<vmem>>, %arg2: memref<1x50xf32, #tpu.memory_space<vmem>>, %arg3: memref<104x50xf32, #tpu.memory_space<vmem>>) attributes {dimension_semantics = [#tpu.dimension_semantics<parallel>], iteration_bounds = array<i64: 1>, scalar_prefetch = 0 : i64, scratch_operands = 0 : i64, tpu.core_type = #tpu.core_type<tc>, window_params = [{transform_indices = @transform_0, window_bounds = array<i64: 104, 1>}, {pipeline_mode = #tpu.pipeline_mode<synchronous>, transform_indices = @transform_1, window_bounds = array<i64: 1, 50>}, {transform_indices = @transform_2, window_bounds = array<i64: 104, 50>}]} {
    %c0 = arith.constant 0 : index
    %c0_0 = arith.constant 0 : index
    %0 = vector.load %arg1[%c0, %c0_0] : memref<104x1xf32, #tpu.memory_space<vmem>>, vector<104x1xf32>
    %c0_1 = arith.constant 0 : index
    %c0_2 = arith.constant 0 : index
    %1 = vector.load %arg2[%c0_1, %c0_2] : memref<1x50xf32, #tpu.memory_space<vmem>>, vector<1x50xf32>
    %2 = vector.broadcast %0 : vector<104x1xf32> to vector<104x50xf32>
    %3 = vector.broadcast %1 : vector<1x50xf32> to vector<104x50xf32>
    %4 = arith.subf %2, %3 : vector<104x50xf32>
    %cst = arith.constant -48.0200043 : f32
    %5 = vector.broadcast %cst : f32 to vector<104x50xf32>
    %6 = arith.mulf %5, %4 : vector<104x50xf32>
    %7 = arith.mulf %6, %4 : vector<104x50xf32>
    %8 = math.exp %7 : vector<104x50xf32>
    %c0_3 = arith.constant 0 : index
    %c0_4 = arith.constant 0 : index
    %9 = vector.load %arg3[%c0_3, %c0_4] : memref<104x50xf32, #tpu.memory_space<vmem>>, vector<104x50xf32>
    tpu.vector_store %arg3[%c0_3, %c0_4], %8 {strides = array<i32>} : memref<104x50xf32, #tpu.memory_space<vmem>>, vector<104x50xf32>,
    return
  }
  func.func @transform_0(%arg0: i32) -> (i32, i32) {
    %c0_i32 = arith.constant 0 : i32
    %c0_i32_0 = arith.constant 0 : i32
    return %arg0, %c0_i32 : i32, i32
  }
  func.func @transform_1(%arg0: i32) -> (i32, i32) {
    %c0_i32 = arith.constant 0 : i32
    %c0_i32_0 = arith.constant 0 : i32
    %c0_i32_1 = arith.constant 0 : i32
    return %c0_i32, %c0_i32_0 : i32, i32
  }
  func.func @transform_2(%arg0: i32) -> (i32, i32) {
    %c0_i32 = arith.constant 0 : i32
    %c0_i32_0 = arith.constant 0 : i32
    return %arg0, %c0_i32 : i32, i32
  }
}

</mosaic_0001>

<bundles_post_ra>
// kernel: tpu_custom_call.1
= control target key start
LH: loop header
LB: loop body
LE: loop exit
PB: predicated region body
PF: predicated region fallthrough
CT: control target
= control target key end

     0   :  { %v207_v0 = vmov 0   ;;  %vm158_vm0 = vcmask 408576   ;;  %s332_s0 = inlined_call_operand.vmem [shape: f32[100,1], index: 0, kind: input, shape index: {}]   ;;  %s333_s1 = inlined_call_operand.vmem [shape: f32[1,50], index: 1, kind: input, shape index: {}]   ;;  %s334_s2 = inlined_call_operand.vmem [shape: f32[100,50], index: 2, kind: output, shape index: {}]  }
   0x1   :  { %178 = vset.pattern.permute.xlu1 %v207_v0  ;;  %177 = vset.pattern.permute.xlu0 %v207_v0  ;;  %v13_v1 = vld [vmem:[%s332_s0 + $0x10] sm:$0xff]  ;;  %v11_v2 = vld [vmem:[%s332_s0] sm:$0xff]  ;;  %v14_v4 = vld [vmem:[%s332_s0 + $0x18] sm:$0xff] }
   0x2   :  { %v15_v3 = vld [vmem:[%s332_s0 + $0x20] sm:$0xff]  ;;  %37 = vperm.xlu1 %178, %v13_v1   ;;  %27 = vperm.xlu0 %177, %v11_v2   ;;  %v12_v5 = vld [vmem:[%s332_s0 + $0x8] sm:$0xff]  ;;  %v18_v7 = vld [vmem:[%s332_s0 + $0x38] sm:$0xff] }
   0x3   :  { %179 = vset.pattern.permute.xlu2 %v207_v0  ;;  %v16_v6 = vld [vmem:[%s332_s0 + $0x28] sm:$0xff]  ;;  %v17_v8 = vld [vmem:[%s332_s0 + $0x30] sm:$0xff]  ;;  %v19_v9 = vld [vmem:[%s332_s0 + $0x40] sm:$0xff] }
   0x4   :  { %47 = vperm.xlu2 %179, %v15_v3   ;;  %v21_v10 = vld [vmem:[%s332_s0 + $0x50] sm:$0xff]  ;;  %v20_v11 = vld [vmem:[%s332_s0 + $0x48] sm:$0xff]  ;;  %v22_v12 = vld [vmem:[%s332_s0 + $0x58] sm:$0xff] }
   0x5   :  { %v23_v13 = vld [vmem:[%s332_s0 + $0x60] sm:$0xff] }
   0x6   :  { %v265_v14 = vld [vmem:[%s333_s1] ss:$0 sm:$0xff] }
   0xa   :  { %42 = vperm.xlu1 %178, %v14_v4   ;;  %32 = vperm.xlu0 %177, %v12_v5  }
   0xc   :  { %52 = vperm.xlu2 %179, %v16_v6  }
  0x12   :  { %62 = vperm.xlu1 %178, %v18_v7   ;;  %57 = vperm.xlu0 %177, %v17_v8  }
  0x14   :  { %67 = vperm.xlu2 %179, %v19_v9  }
  0x1a   :  { %77 = vperm.xlu1 %178, %v21_v10   ;;  %72 = vperm.xlu0 %177, %v20_v11  }
  0x1c   :  { %82 = vperm.xlu2 %179, %v22_v12  }
  0x22   :  { %87 = vperm.xlu0 %177, %v23_v13  }
  0x5e   :  { %v48_v15 = vpop.permute.xlu2 %47 }
  0x5f   :  { %v97_v16 = vsub.f32 %v48_v15, %v265_v14 }
  0x61   :  { %v110_v17 = vmul.f32 -48.020004, %v97_v16 }
  0x63   :  { %v123_v18 = vmul.f32 %v110_v17, %v97_v16 }
  0x65   :  { %v140_v19 = vmul.f32 1.442695, %v123_v18 }
  0x66   :  { %v53_v20 = vpop.permute.xlu2 %52 }
  0x67   :  { %181 = vpow2.f32 %v140_v19  ;;  %v98_v21 = vsub.f32 %v53_v20, %v265_v14 }
  0x69   :  { %v111_v22 = vmul.f32 -48.020004, %v98_v21 }
  0x6b   :  { %v124_v23 = vmul.f32 %v111_v22, %v98_v21 }
  0x6d   :  { %v182_v24 = vpop.eup %181  ;;  %v142_v25 = vmul.f32 1.442695, %v124_v23 }
  0x6e   :  { %163 = vst.msk [vmem:[%s334_s2 + $0x20] sm:$0xff] %vm158_vm0, %v182_v24  ;;  %v68_v26 = vpop.permute.xlu2 %67 }
  0x6f   :  { %183 = vpow2.f32 %v142_v25  ;;  %v101_v27 = vsub.f32 %v68_v26, %v265_v14 }
  0x71   :  { %v114_v28 = vmul.f32 -48.020004, %v101_v27 }
  0x73   :  { %v127_v29 = vmul.f32 %v114_v28, %v101_v27 }
  0x74   :  { %v38_v30 = vpop.permute.xlu1 %37  ;;  %v28_v31 = vpop.permute.xlu0 %27 }
  0x75   :  { %v184_v32 = vpop.eup %183  ;;  %v148_v33 = vmul.f32 1.442695, %v127_v29  ;;  %v95_v34 = vsub.f32 %v38_v30, %v265_v14  ;;  %v93_v35 = vsub.f32 %v28_v31, %v265_v14 }
  0x76   :  { %164 = vst.msk [vmem:[%s334_s2 + $0x28] sm:$0xff] %vm158_vm0, %v184_v32  ;;  %v83_v36 = vpop.permute.xlu2 %82 }
  0x77   :  { %185 = vpow2.f32 %v148_v33  ;;  %v108_v37 = vmul.f32 -48.020004, %v95_v34  ;;  %v106_v38 = vmul.f32 -48.020004, %v93_v35  ;;  %v104_v39 = vsub.f32 %v83_v36, %v265_v14 }
  0x79   :  { %v121_v40 = vmul.f32 %v108_v37, %v95_v34  ;;  %v119_v41 = vmul.f32 %v106_v38, %v93_v35  ;;  %v117_v42 = vmul.f32 -48.020004, %v104_v39 }
  0x7b   :  { %v136_v43 = vmul.f32 1.442695, %v121_v40  ;;  %v132_v44 = vmul.f32 1.442695, %v119_v41  ;;  %v130_v45 = vmul.f32 %v117_v42, %v104_v39 }
  0x7c   :  { %v43_v46 = vpop.permute.xlu1 %42  ;;  %v33_v47 = vpop.permute.xlu0 %32 }
  0x7d   :  { %v186_v48 = vpop.eup %185  ;;  %187 = vpow2.f32 %v136_v43  ;;  %v154_v49 = vmul.f32 1.442695, %v130_v45  ;;  %v96_v50 = vsub.f32 %v43_v46, %v265_v14  ;;  %v94_v51 = vsub.f32 %v33_v47, %v265_v14 }
  0x7e   :  { %167 = vst.msk [vmem:[%s334_s2 + $0x40] sm:$0xff] %vm158_vm0, %v186_v48  ;;  %189 = vpow2.f32 %v132_v44 }
  0x7f   :  { %191 = vpow2.f32 %v154_v49  ;;  %v109_v52 = vmul.f32 -48.020004, %v96_v50  ;;  %v107_v53 = vmul.f32 -48.020004, %v94_v51 }
  0x81   :  { %v122_v54 = vmul.f32 %v109_v52, %v96_v50  ;;  %v120_v55 = vmul.f32 %v107_v53, %v94_v51 }
  0x83   :  { %v188_v56 = vpop.eup %187  ;;  %v138_v57 = vmul.f32 1.442695, %v122_v54  ;;  %v134_v58 = vmul.f32 1.442695, %v120_v55 }
  0x84   :  { %v190_v59 = vpop.eup %189  ;;  %161 = vst.msk [vmem:[%s334_s2 + $0x10] sm:$0xff] %vm158_vm0, %v188_v56  ;;  %v63_v60 = vpop.permute.xlu1 %62 }
  0x85   :  { %v58_v61 = vpop.permute.xlu0 %57  ;;  %v192_v62 = vpop.eup %191  ;;  %159 = vst.msk [vmem:[%s334_s2] sm:$0xff] %vm158_vm0, %v190_v59  ;;  %193 = vpow2.f32 %v138_v57  ;;  %v100_v63 = vsub.f32 %v63_v60, %v265_v14 }
  0x86   :  { %v99_v0 = vsub.f32 %v58_v61, %v265_v14  ;;  %170 = vst.msk [vmem:[%s334_s2 + $0x58] sm:$0xff] %vm158_vm0, %v192_v62  ;;  %195 = vpow2.f32 %v134_v58 }
  0x87   :  { %v113_v1 = vmul.f32 -48.020004, %v100_v63 }
  0x88   :  { %v112_v2 = vmul.f32 -48.020004, %v99_v0 }
  0x89   :  { %v126_v3 = vmul.f32 %v113_v1, %v100_v63 }
  0x8a   :  { %v125_v4 = vmul.f32 %v112_v2, %v99_v0 }
  0x8b   :  { %v194_v5 = vpop.eup %193  ;;  %v146_v6 = vmul.f32 1.442695, %v126_v3 }
  0x8c   :  { %v144_v7 = vmul.f32 1.442695, %v125_v4  ;;  %v196_v8 = vpop.eup %195  ;;  %162 = vst.msk [vmem:[%s334_s2 + $0x18] sm:$0xff] %vm158_vm0, %v194_v5  ;;  %v78_v9 = vpop.permute.xlu1 %77 }
  0x8d   :  { %v73_v10 = vpop.permute.xlu0 %72  ;;  %160 = vst.msk [vmem:[%s334_s2 + $0x8] sm:$0xff] %vm158_vm0, %v196_v8  ;;  %197 = vpow2.f32 %v146_v6  ;;  %v103_v11 = vsub.f32 %v78_v9, %v265_v14 }
  0x8e   :  { %v102_v12 = vsub.f32 %v73_v10, %v265_v14  ;;  %199 = vpow2.f32 %v144_v7 }
  0x8f   :  { %v116_v13 = vmul.f32 -48.020004, %v103_v11 }
  0x90   :  { %v115_v15 = vmul.f32 -48.020004, %v102_v12 }
  0x91   :  { %v129_v16 = vmul.f32 %v116_v13, %v103_v11 }
  0x92   :  { %v128_v17 = vmul.f32 %v115_v15, %v102_v12 }
  0x93   :  { %v198_v18 = vpop.eup %197  ;;  %v152_v19 = vmul.f32 1.442695, %v129_v16 }
  0x94   :  { %v150_v20 = vmul.f32 1.442695, %v128_v17  ;;  %v200_v21 = vpop.eup %199  ;;  %166 = vst.msk [vmem:[%s334_s2 + $0x38] sm:$0xff] %vm158_vm0, %v198_v18 }
  0x95   :  { %v88_v22 = vpop.permute.xlu0 %87  ;;  %165 = vst.msk [vmem:[%s334_s2 + $0x30] sm:$0xff] %vm158_vm0, %v200_v21  ;;  %201 = vpow2.f32 %v152_v19 }
  0x96   :  { %v105_v23 = vsub.f32 %v88_v22, %v265_v14  ;;  %203 = vpow2.f32 %v150_v20 }
  0x98   :  { %v118_v24 = vmul.f32 -48.020004, %v105_v23 }
  0x9a   :  { %v131_v25 = vmul.f32 %v118_v24, %v105_v23 }
  0x9b   :  { %v202_v26 = vpop.eup %201 }
  0x9c   :  { %v156_v27 = vmul.f32 1.442695, %v131_v25  ;;  %v204_v28 = vpop.eup %203  ;;  %169 = vst.msk [vmem:[%s334_s2 + $0x50] sm:$0xff] %vm158_vm0, %v202_v26 }
  0x9d   :  { %168 = vst.msk [vmem:[%s334_s2 + $0x48] sm:$0xff] %vm158_vm0, %v204_v28 }
  0x9e   :  { %205 = vpow2.f32 %v156_v27 }
  0xa4   :  { %v206_v29 = vpop.eup %205 }
  0xa5   :  { %171 = vst.msk [vmem:[%s334_s2 + $0x60] sm:$0xff] %vm158_vm0, %v206_v29 }

</bundles_post_ra>
